<compile_context>
chip_gen: v7x
topology: tpu7x:2x2x1
jax: 0.10.0
libtpu: 0.0.40
codegen_flags: <defaults>
</compile_context>

<pallas_src>
import functools

import jax
import jax.numpy as jnp
from jax.experimental import pallas as pl
from jax.experimental.pallas import tpu as pltpu


def _layernorm_kernel(x_ref, w_ref, b_ref, o_ref, *, eps, affine, c):
    # x_ref: (1, C, T) tile -> normalize each spatial column over the C axis.
    x = x_ref[...].astype(jnp.float32)
    u = jnp.mean(x, axis=1, keepdims=True)                      # (1, 1, T)
    d = x - u
    # torch.std_mean default: unbiased variance (divide by C-1).
    # Note: C == 1 would divide by zero, exactly like the torch reference.
    var = jnp.sum(d * d, axis=1, keepdims=True) * jnp.float32(1.0 / (c - 1))
    s = jnp.sqrt(var)
    # One reciprocal per spatial position (shape (1,1,T)) instead of a full
    # (C,T) per-element divide: C-fold less division work on the VPU path.
    inv = 1.0 / (s + jnp.float32(eps))
    y = d * inv
    if affine:
        y = w_ref[...].astype(jnp.float32) * y + b_ref[...].astype(jnp.float32)
    o_ref[...] = y.astype(o_ref.dtype)


def _pick_hw_tile(hw, c, itemsize=4, budget_bytes=6 * 1024 * 1024):
    """Lane-dense spatial tile: a multiple of 128, sized so double-buffered
    input + output tiles plus f32 temps stay well under the scoped VMEM limit
    on every generation (v7x: 64 MiB physical / 32 MiB scoped default)."""
    per_lane = c * itemsize * 6            # ~2x in-buf + 2x out-buf + f32 temps
    t = max(128, (budget_bytes // per_lane) // 128 * 128)
    t = min(t, 2048)
    if hw <= t:
        return hw                          # full last dim is always a legal block dim
    return t


def layernorm_channels_first(x, weight, bias, *, eps=1e-6, affine=True):
    """x: (B, C, H, W) float32.  weight/bias: (C,).  Returns (B, C, H, W)."""
    B, C, H, W = x.shape
    HW = H * W
    x2 = x.reshape(B, C, HW)

    if not affine or weight is None:
        weight = jnp.ones((C,), dtype=x.dtype)
        bias = jnp.zeros((C,), dtype=x.dtype)
    w2 = weight.reshape(1, C, 1)
    b2 = bias.reshape(1, C, 1)

    # Tile the HW axis: reduction is over C, so HW tiling is embarrassingly
    # parallel and gives the pipeline enough steps to overlap DMA with compute
    # (and gives megacore / 2-TC chips something to shard even when B is small).
    T = _pick_hw_tile(HW, C, jnp.dtype(x.dtype).itemsize)
    n_hw = pl.cdiv(HW, T)

    # Note: with C < 8 (C=4 here) each vreg's sublanes are only half occupied;
    # acceptable for small C, full occupancy returns automatically for C >= 8.

    kernel = functools.partial(_layernorm_kernel, eps=eps, affine=affine, c=C)

    out = pl.pallas_call(
        kernel,
        out_shape=jax.ShapeDtypeStruct((B, C, HW), x.dtype),
        grid_spec=pltpu.PrefetchScalarGridSpec(
            num_scalar_prefetch=0,
            grid=(B, n_hw),
            in_specs=[
                pl.BlockSpec((1, C, T), lambda b, h: (b, 0, h)),
                pl.BlockSpec((1, C, 1), lambda b, h: (0, 0, 0)),
                pl.BlockSpec((1, C, 1), lambda b, h: (0, 0, 0)),
            ],
            out_specs=pl.BlockSpec((1, C, T), lambda b, h: (b, 0, h)),
        ),
        compiler_params=pltpu.CompilerParams(
            dimension_semantics=("parallel", "parallel"),
            vmem_limit_bytes=32 * 1024 * 1024,
        ),
    )(x2, w2, b2)
    return out.reshape(B, C, H, W)


def _reference(x, weight, bias, eps=1e-6):
    # pure-JAX reference of the torch forward (torch.std_mean => unbiased std)
    u = jnp.mean(x, axis=1, keepdims=True)
    c = x.shape[1]
    var = jnp.sum((x - u) ** 2, axis=1, keepdims=True) / (c - 1)
    s = jnp.sqrt(var)
    y = (x - u) / (s + eps)
    return weight.reshape(1, -1, 1, 1) * y + bias.reshape(1, -1, 1, 1)


if __name__ == "__main__":
    key = jax.random.PRNGKey(0)
    B, C, H, W = 2, 4, 16, 16
    x = jax.random.normal(key, (B, C, H, W), dtype=jnp.float32)

    # Deterministic parameter init, matching nn.Parameter(torch.ones/zeros)
    weight = jnp.ones((C,), dtype=jnp.float32)
    bias = jnp.zeros((C,), dtype=jnp.float32)

    out = layernorm_channels_first(x, weight, bias, eps=1e-6, affine=True)
    out = jax.block_until_ready(out)

    ref = _reference(x, weight, bias, eps=1e-6)
    assert out.shape == (B, C, H, W)
    assert jnp.allclose(out, ref, atol=1e-5, rtol=1e-5)

    print("KERNEL_OK")
</pallas_src>

<mosaic_0001>
module attributes {stable_mosaic.version = 11 : i64} {
  func.func @_layernorm_kernel(%arg0: i32, %arg1: i32, %arg2: memref<1x4x256xf32, #tpu.memory_space<vmem>>, %arg3: memref<1x4x1xf32, #tpu.memory_space<vmem>>, %arg4: memref<1x4x1xf32, #tpu.memory_space<vmem>>, %arg5: memref<1x4x256xf32, #tpu.memory_space<vmem>>) attributes {dimension_semantics = [#tpu.dimension_semantics<parallel>, #tpu.dimension_semantics<parallel>], iteration_bounds = array<i64: 2, 1>, scalar_prefetch = 0 : i64, scratch_operands = 0 : i64, tpu.core_type = #tpu.core_type<tc>, window_params = [{transform_indices = @transform_0, window_bounds = array<i64: 1, 4, 256>}, {pipeline_mode = #tpu.pipeline_mode<synchronous>, transform_indices = @transform_1, window_bounds = array<i64: 1, 4, 1>}, {pipeline_mode = #tpu.pipeline_mode<synchronous>, transform_indices = @transform_2, window_bounds = array<i64: 1, 4, 1>}, {transform_indices = @transform_3, window_bounds = array<i64: 1, 4, 256>}]} {
    %c0 = arith.constant 0 : index
    %c0_0 = arith.constant 0 : index
    %c0_1 = arith.constant 0 : index
    %0 = vector.load %arg2[%c0, %c0_0, %c0_1] : memref<1x4x256xf32, #tpu.memory_space<vmem>>, vector<1x4x256xf32>
    %cst = arith.constant dense<0.000000e+00> : vector<1x256xf32>
    %1 = vector.multi_reduction <add>, %0, %cst [1] : vector<1x4x256xf32> to vector<1x256xf32>
    %2 = vector.shape_cast %1 : vector<1x256xf32> to vector<1x1x256xf32>
    %cst_2 = arith.constant 4.000000e+00 : f32
    %3 = vector.broadcast %cst_2 : f32 to vector<1x1x256xf32>
    %4 = arith.divf %2, %3 : vector<1x1x256xf32>
    %5 = vector.broadcast %4 : vector<1x1x256xf32> to vector<1x4x256xf32>
    %6 = arith.subf %0, %5 : vector<1x4x256xf32>
    %7 = arith.mulf %6, %6 : vector<1x4x256xf32>
    %cst_3 = arith.constant dense<0.000000e+00> : vector<1x256xf32>
    %8 = vector.multi_reduction <add>, %7, %cst_3 [1] : vector<1x4x256xf32> to vector<1x256xf32>
    %9 = vector.shape_cast %8 : vector<1x256xf32> to vector<1x1x256xf32>
    %cst_4 = arith.constant 0.333333343 : f32
    %10 = vector.broadcast %cst_4 : f32 to vector<1x1x256xf32>
    %11 = arith.mulf %9, %10 : vector<1x1x256xf32>
    %12 = math.sqrt %11 : vector<1x1x256xf32>
    %cst_5 = arith.constant 9.99999997E-7 : f32
    %13 = vector.broadcast %cst_5 : f32 to vector<1x1x256xf32>
    %14 = arith.addf %12, %13 : vector<1x1x256xf32>
    %cst_6 = arith.constant 1.000000e+00 : f32
    %15 = vector.broadcast %cst_6 : f32 to vector<1x1x256xf32>
    %16 = arith.divf %15, %14 : vector<1x1x256xf32>
    %17 = vector.broadcast %16 : vector<1x1x256xf32> to vector<1x4x256xf32>
    %18 = arith.mulf %6, %17 : vector<1x4x256xf32>
    %c0_7 = arith.constant 0 : index
    %c0_8 = arith.constant 0 : index
    %c0_9 = arith.constant 0 : index
    %19 = vector.load %arg3[%c0_7, %c0_8, %c0_9] : memref<1x4x1xf32, #tpu.memory_space<vmem>>, vector<1x4x1xf32>
    %20 = vector.broadcast %19 : vector<1x4x1xf32> to vector<1x4x256xf32>
    %21 = arith.mulf %20, %18 : vector<1x4x256xf32>
    %c0_10 = arith.constant 0 : index
    %c0_11 = arith.constant 0 : index
    %c0_12 = arith.constant 0 : index
    %22 = vector.load %arg4[%c0_10, %c0_11, %c0_12] : memref<1x4x1xf32, #tpu.memory_space<vmem>>, vector<1x4x1xf32>
    %23 = vector.broadcast %22 : vector<1x4x1xf32> to vector<1x4x256xf32>
    %24 = arith.addf %21, %23 : vector<1x4x256xf32>
    %c0_13 = arith.constant 0 : index
    %c0_14 = arith.constant 0 : index
    %c0_15 = arith.constant 0 : index
    %25 = vector.load %arg5[%c0_13, %c0_14, %c0_15] : memref<1x4x256xf32, #tpu.memory_space<vmem>>, vector<1x4x256xf32>
    tpu.vector_store %arg5[%c0_13, %c0_14, %c0_15], %24 {strides = array<i32>} : memref<1x4x256xf32, #tpu.memory_space<vmem>>, vector<1x4x256xf32>,
    return
  }
  func.func @transform_0(%arg0: i32, %arg1: i32) -> (i32, i32, i32) {
    %c0_i32 = arith.constant 0 : i32
    %c0_i32_0 = arith.constant 0 : i32
    return %arg0, %c0_i32, %arg1 : i32, i32, i32
  }
  func.func @transform_1(%arg0: i32, %arg1: i32) -> (i32, i32, i32) {
    %c0_i32 = arith.constant 0 : i32
    %c0_i32_0 = arith.constant 0 : i32
    %c0_i32_1 = arith.constant 0 : i32
    %c0_i32_2 = arith.constant 0 : i32
    return %c0_i32, %c0_i32_0, %c0_i32_1 : i32, i32, i32
  }
  func.func @transform_2(%arg0: i32, %arg1: i32) -> (i32, i32, i32) {
    %c0_i32 = arith.constant 0 : i32
    %c0_i32_0 = arith.constant 0 : i32
    %c0_i32_1 = arith.constant 0 : i32
    %c0_i32_2 = arith.constant 0 : i32
    return %c0_i32, %c0_i32_0, %c0_i32_1 : i32, i32, i32
  }
  func.func @transform_3(%arg0: i32, %arg1: i32) -> (i32, i32, i32) {
    %c0_i32 = arith.constant 0 : i32
    %c0_i32_0 = arith.constant 0 : i32
    return %arg0, %c0_i32, %arg1 : i32, i32, i32
  }
}

</mosaic_0001>

<bundles_post_ra>
// kernel: tpu_custom_call.1
= control target key start
LH: loop header
LB: loop body
LE: loop exit
PB: predicated region body
PF: predicated region fallthrough
CT: control target
= control target key end

     0   :  { %8 = vsyncpa [#allocation3], 0  ;;  %s817_s0 = inlined_call_operand.hbm [shape: f32[2,4,256], index: 0, kind: input, shape index: {}]   ;;  %s818_s1 = inlined_call_operand.vmem [shape: f32[1,4,1], index: 1, kind: input, shape index: {}]   ;;  %s819_s2 = inlined_call_operand.vmem [shape: f32[1,4,1], index: 2, kind: input, shape index: {}]   ;;  %s820_s3 = inlined_call_operand.hbm [shape: f32[2,4,256], index: 3, kind: output, shape index: {}]  }
   0x1   :  { %10 = vsyncpa [#allocation3 + $0x1], 0 }
   0x2   :  { %11 = vsyncpa [#allocation4], 0 }
   0x3   :  { %13 = vsyncpa [#allocation4 + $0x1], 0  ;;  %s631_s12 = smov 0   ;;  %s633_s13 = smov 0  }
   0x4   :  { %s635_s14 = smov 0   ;;  %s637_s15 = smov 0  }
   0x5   :  { %s639_s16 = smov 0   ;;  %s641_s17 = smov 0  }
   0x6 LB: > { %s404_s18 = sadd.s32 4294967295, %s606_s17   ;;  %s405_s19 = sadd.s32 4294967294, %s606_s17   ;;  %s606_s17 = sphi %s641_s17, %s19_s17   ;;  %s602_s16 = sphi %s639_s16, %s836_s16   ;;  %s598_s15 = sphi %s637_s15, %s835_s15   ;;  %s594_s14 = sphi %s635_s14, %s834_s14   ;;  %s590_s13 = sphi %s633_s13, %s833_s13   ;;  %s586_s12 = sphi %s631_s12, %s832_s12  }
   0x7   : > { %s31_s20 = sadd.s32 1, %s602_s16  ;;  %s40_s21 = sadd.s32 1, %s594_s14 }
   0x8   : > { %p33_p0 = scmp.ge.s32.totalorder %s31_s20, 2  ;;  %p47_p1 = scmp.ne.s32.totalorder %s594_s14, %s590_s13 }
   0x9   : > { %p48_p2 = scmp.eq.s32.totalorder %s606_s17, 0  ;;  %p53_p3 = scmp.ne.s32.totalorder %s590_s13, %s586_s12 }
   0xa   : > { %s838_s20 = smov (%p33_p0, %s31_s20), 0  ;;  %p54_p5 = scmp.eq.s32.totalorder %s404_s18, 0 }
   0xb   : > { %p672_p4 = por %p48_p2, %p47_p1  ;;  %s35_s23 = ssub.s32 %s602_s16, %s838_s20 }
   0xc   : > { %p121_p6 = scmp.eq.s32.totalorder %s404_s18, 1  ;;  %p38_p7 = scmp.eq.s32.totalorder %s35_s23, 0 }
   0xd   : > { %p678_p8 = por %p54_p5, %p53_p3  ;;  %p127_p10 = scmp.eq.s32.totalorder %s405_s19, 1 }
   0xe   : > { %p682_p9 = por %p121_p6, %p47_p1  ;;  %p433_p13 = scmp.lt.s32.totalorder %s606_s17, 2 }
   0xf   : > { %s687_s26 = scalar_select %p38_p7, %s594_s14, %s40_s21  }
  0x10   : > { %s824_s25 = scalar_select %p682_p9, 1, 0 }
  0x11   : > { %p689_p11 = por %p127_p10, %p53_p3  ;;  %s153_s28 = sand.u32 1, %s594_s14  }
  0x12   : > { %s408_s29 = sshll.u32 %s153_s28, 3  ;;  %s419_s30 = sshll.u32 %s602_s16, 7 }
  0x13   : > { %s825_s27 = scalar_select %p689_p11, 1, 0 }
  0x14   : > { %s700_s6 = scalar_lea.hbm %s817_s0, %s419_s30  ;;  %s157_s7 = scalar_lea.vmem [#allocation2], %s408_s29 }
  0x15   : > { %s167_s8 = sshll.u32 %s157_s7, 4  ;;  %p706_p0 = pnand %p433_p13, %p672_p4  ;;  %s702_s8 = int_to_ptr.vmem [resolvable:$true] %s167_s8 }
  0x16   : > { %s154_s10 = scalar_lea.sflag [#allocation3], %s153_s28  ;;  %s494_s11 = scalar_lea.hbm %s700_s6, 128 }
  0x17   : > { %p495_p3 = scmp.ne.s32.totalorder %s700_s6, %s494_s11  ;;  %p496_p5 = pneg %p706_p0 }
  0x18   : > { %s499_s21 = scalar_lea.hbm %s817_s0, 256  ;;  %p500_p4 = scmp.lt.u32.totalorder %s700_s6, %s817_s0 }
  0x19   : > { %p497_p6 = pnand %p496_p5, %p495_p3  ;;  %p501_p10 = scmp.lt.u32.totalorder %s499_s21, %s494_s11 }
  0x1a   : > { %p503_p12 = scmp.lt.u32.totalorder %s494_s11, %s700_s6 }
  0x1b   : > { %p498_p7 = pneg %p497_p6  ;;  %p502_p13 = por %p501_p10, %p500_p4 }
  0x1d   : > { %p504_p1 = por %p503_p12, %p502_p13 }
  0x1f   : > { %p505_p2 = pnand %p504_p1, %p498_p7 }
  0x21   : > { %508 = shalt.err (!%p505_p2)
}
  0x22   : > { %s509_s28 = scalar_lea.vmem %s702_s8, 128  ;;  %s608_s29 = smov [#allocation2]  }
  0x23   : > { %p510_p3 = scmp.ne.s32.totalorder %s702_s8, %s509_s28  ;;  %s514_s30 = sshll.u32 %s608_s29, 4  ;;  %s515_s30 = int_to_ptr.vmem [resolvable:$false] %s514_s30 }
  0x24   : > { %s516_s4 = scalar_lea.vmem %s515_s30, 256  ;;  %p517_p9 = scmp.lt.s32.totalorder %s702_s8, %s515_s30 }
  0x25   : > { %p512_p6 = pnand %p510_p3, %p496_p5  ;;  %p518_p4 = scmp.lt.s32.totalorder %s516_s4, %s509_s28 }
  0x27   : > { %p513_p11 = pneg %p512_p6  ;;  %p519_p10 = por %p518_p4, %p517_p9 }
  0x29   : > { %p520_p12 = pnand %p519_p10, %p513_p11 }
  0x2b   : > { %523 = shalt.err (!%p520_p12)
}
  0x2c   : > { %428 = dma.hbm_to_vmem [thread:$0]  (!%p706_p0), %s700_s6, 128, %s702_s8, %s154_s10  }
  0x2d   : > { %p827_p1 = scmp.lt.s32.totalorder %s606_s17, 3  ;;  %p828_p2 = scmp.ge.s32.totalorder %s606_s17, 1 }
  0x2f   : > { %p173_p5 = pnand %p828_p2, %p827_p1 }
  0x30   : > { %s742_s5 = sand.u32 (!%p173_p5), 1, %s590_s13  }
  0x31   : > { %176 = sbr.rel (%p173_p5) target bundleno = 209 (0xd1), region = 32  ;;  %s412_s7 = sshll.u32 (!%p173_p5), %s742_s5, 3 }
  0x32   : > { %s179_s11 = scalar_lea.sflag (!%p173_p5), [#allocation3], %s742_s5  ;;  %s182_s9 = scalar_lea.vmem (!%p173_p5), [#allocation2], %s412_s7 }
  0x38   : > { %577 = dma.done.wait (%p678_p8), %s179_s11, 128  }
  0x39   : > { %579 = vsyncadd (%p678_p8), %s179_s11, 4294967168  ;;  %v609_v0 = vmov 0   ;;  %vm211_vm0 = vcmask 1043456   ;;  %v279_v1 = vld [vmem:[%s818_s1] sm:$0xf]  ;;  %s420_s24 = sshll.u32 %s598_s15, 7 }
  0x3a   : > { %484 = vset.pattern.permute.xlu0 %v609_v0  ;;  %v207_v2 = vld [vmem:[%s182_s9] sm:$0xff]  ;;  %s204_s19 = scalar_lea.vmem [#allocation5], %s412_s7  ;;  %s768_s28 = scalar_lea.hbm %s820_s3, %s420_s24 }
  0x3b   : > { %282 = vperm.xlu0 %484, %v279_v1   ;;  %v209_v3 = vcombine.high %v207_v2, %v207_v2  ;;  %v212_v4 = vsel %vm211_vm0, %v207_v2, 0.0  ;;  %v290_v5 = vld [vmem:[%s819_s2] sm:$0xf]  ;;  %s320_s21 = sshll.u32 %s204_s19, 4  ;;  %s304_s29 = scalar_lea.sflag [#allocation4], %s742_s5  ;;  %s770_s21 = int_to_ptr.vmem [resolvable:$true] %s320_s21 }
  0x3c   : > { %v213_v7 = vrot.slane %v212_v4, 4  ;;  %s524_s30 = scalar_lea.vmem %s770_s21, 128  ;;  %p829_p9 = scmp.ne.s32.totalorder %s824_s25, 0 }
  0x3d   : > { %v219_v6 = vsel %vm211_vm0, %v209_v3, 0.0  ;;  %p525_p8 = scmp.ne.s32.totalorder %s770_s21, %s524_s30  ;;  %s610_s15 = smov [#allocation5]  }
  0x3e   : > { %v220_v8 = vrot.slane %v219_v6, 4  ;;  %v214_v9 = vadd.f32 %v213_v7, %v212_v4  ;;  %s528_s4 = sshll.u32 %s610_s15, 4  ;;  %s529_s4 = int_to_ptr.vmem [resolvable:$false] %s528_s4 }
  0x3f   : > { %293 = vperm.xlu0 %484, %v290_v5   ;;  %p526_p11 = pnand %p525_p8, %p829_p9  ;;  %s530_s7 = scalar_lea.vmem %s529_s4, 256 }
  0x40   : > { %v221_v10 = vadd.f32 %v220_v8, %v219_v6  ;;  %v215_v11 = vrot.slane %v214_v9, 2  ;;  %p531_p7 = scmp.lt.s32.totalorder %s770_s21, %s529_s4  ;;  %p532_p13 = scmp.lt.s32.totalorder %s530_s7, %s524_s30 }
  0x41   : > { %p527_p0 = pneg %p526_p11 }
  0x42   : > { %v222_v12 = vrot.slane %v221_v10, 2  ;;  %v216_v13 = vadd.f32 %v215_v11, %v214_v9  ;;  %p533_p3 = por %p532_p13, %p531_p7 }
  0x44   : > { %v223_v14 = vadd.f32 %v222_v12, %v221_v10  ;;  %v217_v15 = vrot.slane %v216_v13, 1  ;;  %p534_p6 = pnand %p533_p3, %p527_p0 }
  0x46   : > { %v224_v16 = vrot.slane %v223_v14, 1  ;;  %v218_v17 = vadd.f32 %v217_v15, %v216_v13 }
  0x48   : > { %v225_v18 = vadd.f32 %v224_v16, %v223_v14  ;;  %v227_v19 = vmul.f32 0.25, %v218_v17 }
  0x4a   : > { %v228_v20 = vmul.f32 0.25, %v225_v18 }
  0x4c   : > { %v231_v21 = vcombine.low %v227_v19, %v228_v20 }
  0x4e   : > { %v233_v22 = vsub.f32 %v207_v2, %v231_v21 }
  0x50   : > { %v234_v23 = vmul.f32 %v233_v22, %v233_v22 }
  0x52   : > { %v236_v24 = vcombine.high %v234_v23, %v234_v23  ;;  %v238_v25 = vsel %vm211_vm0, %v234_v23, 0.0 }
  0x53   : > { %v239_v27 = vrot.slane %v238_v25, 4 }
  0x54   : > { %v245_v26 = vsel %vm211_vm0, %v236_v24, 0.0 }
  0x55   : > { %v246_v28 = vrot.slane %v245_v26, 4  ;;  %v240_v29 = vadd.f32 %v239_v27, %v238_v25 }
  0x57   : > { %v247_v30 = vadd.f32 %v246_v28, %v245_v26  ;;  %v241_v31 = vrot.slane %v240_v29, 2 }
  0x59   : > { %v248_v32 = vrot.slane %v247_v30, 2  ;;  %v242_v33 = vadd.f32 %v241_v31, %v240_v29 }
  0x5b   : > { %v249_v34 = vadd.f32 %v248_v32, %v247_v30  ;;  %v243_v35 = vrot.slane %v242_v33, 1 }
  0x5d   : > { %v250_v36 = vrot.slane %v249_v34, 1  ;;  %v244_v37 = vadd.f32 %v243_v35, %v242_v33 }
  0x5f   : > { %v251_v38 = vadd.f32 %v250_v36, %v249_v34  ;;  %v252_v39 = vmul.f32 0.33333334, %v244_v37 }
  0x61   : > { %v253_v40 = vmul.f32 0.33333334, %v251_v38  ;;  %486 = vrsqrt.f32 %v252_v39  ;;  %vm256_vm1 = vcmp.eq.f32.partialorder %v252_v39, inf  ;;  %v259_v45 = vand.u32 2147483648, %v252_v39 }
  0x62   : > { %vm258_vm3 = vcmp.eq.f32.partialorder %v252_v39, 0.0 }
  0x63   : > { %488 = vrsqrt.f32 %v253_v40  ;;  %vm263_vm2 = vcmp.eq.f32.partialorder %v253_v40, inf  ;;  %v266_v47 = vand.u32 2147483648, %v253_v40  ;;  %vm265_vm4 = vcmp.eq.f32.partialorder %v253_v40, 0.0 }
  0x6b   : > { %v487_v41 = vpop.eup %486 }
  0x6c   : > { %v255_v43 = vmul.f32 %v487_v41, %v252_v39 }
  0x6d   : > { %v489_v42 = vpop.eup %488 }
  0x6e   : > { %v262_v44 = vmul.f32 %v489_v42, %v253_v40  ;;  %v257_v46 = vsel %vm256_vm1, %v252_v39, %v255_v43 }
  0x6f   : > { %v260_v49 = vsel %vm258_vm3, %v259_v45, %v257_v46 }
  0x70   : > { %v264_v48 = vsel %vm263_vm2, %v253_v40, %v262_v44  ;;  %v268_v51 = vadd.f32 1e-06, %v260_v49 }
  0x71   : > { %v267_v50 = vsel %vm265_vm4, %v266_v47, %v264_v48 }
  0x72   : > { %v269_v52 = vadd.f32 1e-06, %v267_v50  ;;  %490 = vrcp.f32 %v268_v51 }
  0x74   : > { %492 = vrcp.f32 %v269_v52 }
  0x7c   : > { %v491_v53 = vpop.eup %490 }
  0x7e   : > { %v493_v54 = vpop.eup %492 }
  0x7f   : > { %v276_v55 = vcombine.low %v491_v53, %v493_v54 }
  0x81   : > { %v278_v56 = vmul.f32 %v276_v55, %v233_v22 }
  0x83   : > { %v286_v57 = vcombine.high %v278_v56, %v278_v56 }
  0xba   : > { %v283_v58 = vpop.permute.xlu0 %282 }
  0xbb   : > { %v288_v59 = vmul.f32 %v283_v58, %v278_v56  ;;  %v289_v60 = vmul.f32 %v286_v57, %v283_v58 }
  0xbe   : > { %v294_v61 = vpop.permute.xlu0 %293 }
  0xbf   : > { %v296_v62 = vadd.f32 %v294_v61, %v288_v59  ;;  %v297_v63 = vadd.f32 %v294_v61, %v289_v60 }
  0xc1   : > { %v300_v0 = vcombine.low %v296_v62, %v297_v63 }
  0xc3   : > { %302 = vst [vmem:[%s204_s19] sm:$0xff] %v300_v0 }
  0xc4   : > { %537 = shalt.err (!%p534_p6)
}
  0xc5   : > { %s538_s5 = scalar_lea.hbm %s768_s28, 128  ;;  %s542_s6 = scalar_lea.hbm %s820_s3, 256 }
  0xc6   : > { %p539_p4 = scmp.ne.s32.totalorder %s768_s28, %s538_s5  ;;  %p543_p1 = scmp.lt.u32.totalorder %s768_s28, %s820_s3 }
  0xc7   : > { %p544_p2 = scmp.lt.u32.totalorder %s542_s6, %s538_s5  ;;  %p546_p8 = scmp.lt.u32.totalorder %s538_s5, %s768_s28 }
  0xc8   : > { %p540_p10 = pnand %p539_p4, %p829_p9 }
  0xc9   : > { %p545_p5 = por %p544_p2, %p543_p1 }
  0xca   : > { %p541_p12 = pneg %p540_p10 }
  0xcb   : > { %p547_p11 = por %p546_p8, %p545_p5 }
  0xcd   : > { %p548_p0 = pnand %p547_p11, %p541_p12 }
  0xcf   : > { %551 = shalt.err (!%p548_p0)
}
  0xd0   : > { %423 = dma.vmem_to_hbm [thread:$0]  (%p829_p9), %s770_s21, 128, %s768_s28, %s304_s29  }
  0xd1 PF: > { %s332_s18 = sand.u32 1, %s586_s12   ;;  %p830_p7 = scmp.ne.s32.totalorder %s825_s27, 0 }
  0xd2   : > { %p831_p13 = scmp.ge.s32.totalorder %s606_s17, 2  ;;  %s333_s24 = scalar_lea.sflag [#allocation4], %s332_s18 }
  0xd4   : > { %p430_p3 = pnand %p831_p13, %p830_p7 }
  0xd6   : > { %581 = dma.done.wait (!%p430_p3), %s333_s24, 128  }
  0xd7   : > { %583 = vsyncadd (!%p430_p3), %s333_s24, 4294967168  ;;  %s19_s17 = sadd.s32 1, %s606_s17   ;;  %s832_s12 = smov %s590_s13 }
  0xd8   : > { %p16_p6 = scmp.ge.s32.totalorder %s19_s17, 4   ;;  %s833_s13 = smov %s594_s14 }
  0xd9   : > { %s834_s14 = smov %s687_s26  ;;  %s835_s15 = smov %s602_s16 }
  0xda   : > { %s836_s16 = smov %s838_s20  ;;  %18 = sbr.rel (!%p16_p6) target bundleno = 6 (0x6), region = 77 }
  0xe1   :  { %338 = vsyncpa [#allocation3], 1 }
  0xe2   :  { %340 = vsyncpa [#allocation3 + $0x1], 1 }
  0xe3   :  { %341 = vsyncpa [#allocation4], 1 }
  0xe4   :  { %343 = vsyncpa [#allocation4 + $0x1], 1 }

</bundles_post_ra>
